<compile_context>
chip_gen: v7x
topology: tpu7x:2x2x1
jax: 0.10.0
libtpu: 0.0.40
codegen_flags: <defaults>
</compile_context>

<pallas_src>
import functools

import jax
import jax.numpy as jnp
from jax.experimental import pallas as pl
from jax.experimental.pallas import tpu as pltpu


def attentive_pooling_kernel(kb_ref, x_ref, kw_ref, w_ref, o_ref,
                             m_ref, d_ref, acc_ref, *, approx_recip):
    # kb_ref : (1,)         k.bias scalar (SMEM)
    # x_ref  : (TB, TS, D)  batch x sequence tile of the input
    # kw_ref : (1, D)       k.weight, lane-dense, single-buffered
    # w_ref  : (D, Dp)      W (output columns padded to 128), single-buffered
    # o_ref  : (TB, Dp)     pooled output tile (lane-dense store)
    # m_ref  : (TB, 1) f32  running max                    (scratch)
    # d_ref  : (TB, 1) f32  running softmax denominator    (scratch)
    # acc_ref: (TB, D) f32  running un-normalized pooled x (scratch)
    s_idx = pl.program_id(1)

    @pl.when(s_idx == 0)
    def _():
        m_ref[...] = jnp.full_like(m_ref, -jnp.inf)
        d_ref[...] = jnp.zeros_like(d_ref)
        acc_ref[...] = jnp.zeros_like(acc_ref)

    # Attention scores on a lane-dense (TB, TS) layout: VPU multiply + lane
    # reduce (keeps the MXU free for the epilogue; products promote to f32
    # before the reductions even when x is bf16, since kw is f32).
    kw = kw_ref[...][None]                                       # (1, 1, D)
    scores = jnp.sum(x_ref[...] * kw, axis=-1) + kb_ref[0]       # (TB, TS) f32

    # Online (flash-style) softmax statistics across the sequence grid axis.
    m_prev = m_ref[...]                                          # (TB, 1)
    m_new = jnp.maximum(m_prev, jnp.max(scores, axis=-1, keepdims=True))
    alpha = jnp.exp(m_prev - m_new)                              # (TB, 1)
    e = jnp.exp(scores - m_new)                                  # (TB, TS)

    d_ref[...] = alpha * d_ref[...] + jnp.sum(e, axis=-1, keepdims=True)
    # Pool the *un-normalized* weights; normalize once at the end.  Re-read
    # x_ref at the use (vld slots are plentiful; keeps live ranges short).
    acc_ref[...] = alpha * acc_ref[...] + jnp.sum(e[:, :, None] * x_ref[...],
                                                  axis=1)
    m_ref[...] = m_new

    @pl.when(s_idx == pl.num_programs(1) - 1)
    def _():
        inv = pl.reciprocal(d_ref[...], approx=approx_recip)     # EUP slot
        pooled = acc_ref[...] * inv                              # (TB, D) f32
        # single (TB, D) @ (D, Dp) MXU matmul epilogue
        o_ref[...] = jnp.dot(
            pooled, w_ref[...], preferred_element_type=jnp.float32
        ).astype(o_ref.dtype)


def _vmem_capacity_bytes():
    try:
        return int(pltpu.get_tpu_info().vmem_capacity_bytes)
    except Exception:
        return 64 << 20  # conservative fallback (v7x per-TC physical VMEM)


def _footprint_bytes(tb, ts, D, Dp, x_itemsize):
    x_tile = 2 * tb * ts * D * x_itemsize       # double-buffered x tile
    out_tile = 2 * tb * Dp * x_itemsize         # double-buffered output tile
    w = D * Dp * 4                              # W (single-buffered, f32)
    kw = 8 * max(D, 128) * 4                    # k.weight tile (padded)
    scratch = tb * D * 4 + 2 * tb * 128 * 4     # acc + m/denom scratch (padded)
    temps = tb * ts * D * 4 + 3 * tb * ts * 4   # product / exp temporaries
    return x_tile + out_tile + w + kw + scratch + temps


def _select_tiles(B, S, D, Dp, x_itemsize, budget):
    """Pick (tb, ts) tile sizes that fit the VMEM budget."""
    tb_cands = [t for t in (512, 256, 128, 64, 32, 16, 8) if t <= B and B % t == 0]
    if not tb_cands:
        # TODO(synk): pad B (or mask a last partial tile) for ragged batch
        # sizes instead of falling back to a single whole-batch block.
        tb_cands = [B]
    ts_cands = [S] + [t for t in (4096, 2048, 1024, 512, 256, 128, 64, 32, 16, 8)
                      if t < S and S % t == 0]
    # Prefer >= 2 batch grid steps so the "parallel" batch axis shards across
    # both TensorCores on v7x (and pipelines DMA/compute everywhere).
    multi = [t for t in tb_cands if B // t >= 2]
    ordered = multi + [t for t in tb_cands if t not in multi]
    for tb in ordered:                      # largest tb first (MXU epilogue)
        for ts in ts_cands:                 # then largest ts that fits
            if _footprint_bytes(tb, ts, D, Dp, x_itemsize) <= budget:
                return tb, ts
    return min(tb_cands), min(ts_cands)     # last resort (may exceed budget)


def attentive_pooling(x, k_weight, k_bias, W, *, tb=None, ts=None,
                      approx_recip=True):
    """x: (B, S, D); k_weight: (1, D); k_bias: (1,); W: (D, D) -> (B, D)."""
    B, S, D = x.shape
    # Parameters kept f32 so score/pool reductions accumulate in f32 even for
    # bf16 activations.
    k_weight = k_weight.astype(jnp.float32)
    k_bias = k_bias.astype(jnp.float32)
    W = W.astype(jnp.float32)

    # Lane-dense output store: pad W's output columns to a multiple of 128
    # only when needed; the wrapper slice back to D is minor vs. input traffic.
    Dp = D if D % 128 == 0 else ((D + 127) // 128) * 128
    Wp = W if Dp == D else jnp.pad(W, ((0, 0), (0, Dp - D)))

    x_itemsize = x.dtype.itemsize
    vmem_cap = _vmem_capacity_bytes()
    budget = int(vmem_cap * 0.70)           # leave headroom for Mosaic scratch
    if tb is None or ts is None:
        auto_tb, auto_ts = _select_tiles(B, S, D, Dp, x_itemsize, budget)
        tb = auto_tb if tb is None else tb
        ts = auto_ts if ts is None else ts
    assert B % tb == 0 and S % ts == 0, "tile sizes must divide (B, S)"
    grid_b, grid_s = B // tb, S // ts

    need = _footprint_bytes(tb, ts, D, Dp, x_itemsize)
    # Deepen the x pipeline when there are enough grid steps and spare VMEM
    # (hides per-step DMA gaps from shrunken tiles; matters most on v7x HBM).
    extra_buf = tb * ts * D * x_itemsize
    x_buffers = 3 if (grid_b * grid_s >= 3 and need + extra_buf <= budget) else 2
    if x_buffers == 3:
        need += extra_buf
        x_spec = pl.BlockSpec((tb, ts, D), lambda b, s: (b, s, 0),
                              pipeline_mode=pl.Buffered(3))
    else:
        x_spec = pl.BlockSpec((tb, ts, D), lambda b, s: (b, s, 0))
    vmem_limit = int(min(vmem_cap * 0.95, max(need + (4 << 20), 32 << 20)))

    kernel = functools.partial(attentive_pooling_kernel,
                               approx_recip=approx_recip)

    out = pl.pallas_call(
        kernel,
        out_shape=jax.ShapeDtypeStruct((B, Dp), x.dtype),
        grid_spec=pltpu.PrefetchScalarGridSpec(
            num_scalar_prefetch=0,
            grid=(grid_b, grid_s),
            in_specs=[
                # k.bias scalar: keep in SMEM, untiled
                pl.BlockSpec(memory_space=pltpu.MemorySpace.SMEM),
                # (tb, ts, D) tile of the input
                x_spec,
                # k.weight (1, D): grid-invariant -> single-buffered
                pl.BlockSpec((1, D), lambda b, s: (0, 0),
                             pipeline_mode=pl.Buffered(1)),
                # W (D, Dp): grid-invariant -> single-buffered
                pl.BlockSpec((D, Dp), lambda b, s: (0, 0),
                             pipeline_mode=pl.Buffered(1)),
            ],
            out_specs=pl.BlockSpec((tb, Dp), lambda b, s: (b, 0)),
            scratch_shapes=[
                pltpu.VMEM((tb, 1), jnp.float32),   # running max
                pltpu.VMEM((tb, 1), jnp.float32),   # running denominator
                pltpu.VMEM((tb, D), jnp.float32),   # un-normalized pooled sum
            ],
        ),
        compiler_params=pltpu.CompilerParams(
            dimension_semantics=("parallel", "arbitrary"),
            vmem_limit_bytes=vmem_limit),
    )(k_bias, x, k_weight, Wp)

    return out[:, :D] if Dp != D else out


def attentive_pooling_ref(x, k_weight, k_bias, W):
    # pure-JAX reference mirroring the PyTorch forward (original op order).
    attns = jnp.einsum("bsd,od->bso", x, k_weight)[..., 0] + k_bias[0]   # (B, S)
    attns = jax.nn.softmax(attns, axis=1)
    y = jnp.einsum("bsd,de->bse", x, W)                                  # (B, S, D)
    return jnp.einsum("bs,bsd->bd", attns, y)                            # (B, D)


if __name__ == "__main__":
    B, S, D = 2, 8, 32  # dnn_dims[-1] == D

    key = jax.random.PRNGKey(0)
    kx, kkw, kkb, kW = jax.random.split(key, 4)

    # deterministic params mirroring init_weights(): k.weight, W ~ N(0, 0.01)
    x = jax.random.normal(kx, (B, S, D), dtype=jnp.float32)
    k_weight = 0.01 * jax.random.normal(kkw, (1, D), dtype=jnp.float32)
    k_bias = 0.01 * jax.random.normal(kkb, (1,), dtype=jnp.float32)
    W = 0.01 * jax.random.normal(kW, (D, D), dtype=jnp.float32)

    out = attentive_pooling(x, k_weight, k_bias, W)
    out = jax.block_until_ready(out)

    ref = attentive_pooling_ref(x, k_weight, k_bias, W)
    assert out.shape == (B, D)
    # tolerance covers the approx EUP reciprocal and the pool-then-project
    # reorder vs. the reference op order.
    assert jnp.allclose(out, ref, atol=1e-4, rtol=1e-3), float(
        jnp.max(jnp.abs(out - ref)))

    print("KERNEL_OK")
</pallas_src>

<mosaic_0001>
module attributes {stable_mosaic.version = 11 : i64} {
  func.func @attentive_pooling_kernel(%arg0: i32, %arg1: i32, %arg2: memref<1xf32, #tpu.memory_space<smem>>, %arg3: memref<2x8x32xf32, #tpu.memory_space<vmem>>, %arg4: memref<1x32xf32, #tpu.memory_space<vmem>>, %arg5: memref<32x128xf32, #tpu.memory_space<vmem>>, %arg6: memref<2x128xf32, #tpu.memory_space<vmem>>, %arg7: memref<2x1xf32, #tpu.memory_space<vmem>>, %arg8: memref<2x1xf32, #tpu.memory_space<vmem>>, %arg9: memref<2x32xf32, #tpu.memory_space<vmem>>) attributes {dimension_semantics = [#tpu.dimension_semantics<parallel>, #tpu.dimension_semantics<arbitrary>], iteration_bounds = array<i64: 1, 1>, scalar_prefetch = 0 : i64, scratch_operands = 3 : i64, tpu.core_type = #tpu.core_type<tc>, window_params = [{transform_indices = @transform_0, window_bounds = array<i64: 1>}, {transform_indices = @transform_1, window_bounds = array<i64: 2, 8, 32>}, {pipeline_mode = #tpu.pipeline_mode<synchronous>, transform_indices = @transform_2, window_bounds = array<i64: 1, 32>}, {pipeline_mode = #tpu.pipeline_mode<synchronous>, transform_indices = @transform_3, window_bounds = array<i64: 32, 128>}, {transform_indices = @transform_4, window_bounds = array<i64: 2, 128>}]} {
    %c0_i32 = arith.constant 0 : i32
    %0 = arith.cmpi eq, %arg1, %c0_i32 : i32
    %1 = arith.extui %0 : i1 to i32
    %c0_i32_0 = arith.constant 0 : i32
    %2 = arith.cmpi ne, %1, %c0_i32_0 : i32
    scf.if %2 {
      %cst_26 = arith.constant 0xFF800000 : f32
      %41 = vector.broadcast %cst_26 : f32 to vector<2x1xf32>
      %c0_27 = arith.constant 0 : index
      %c0_28 = arith.constant 0 : index
      %42 = vector.load %arg7[%c0_27, %c0_28] : memref<2x1xf32, #tpu.memory_space<vmem>>, vector<2x1xf32>
      tpu.vector_store %arg7[%c0_27, %c0_28], %41 {strides = array<i32>} : memref<2x1xf32, #tpu.memory_space<vmem>>, vector<2x1xf32>,
      %cst_29 = arith.constant 0.000000e+00 : f32
      %43 = vector.broadcast %cst_29 : f32 to vector<2x1xf32>
      %c0_30 = arith.constant 0 : index
      %c0_31 = arith.constant 0 : index
      %44 = vector.load %arg8[%c0_30, %c0_31] : memref<2x1xf32, #tpu.memory_space<vmem>>, vector<2x1xf32>
      tpu.vector_store %arg8[%c0_30, %c0_31], %43 {strides = array<i32>} : memref<2x1xf32, #tpu.memory_space<vmem>>, vector<2x1xf32>,
      %cst_32 = arith.constant 0.000000e+00 : f32
      %45 = vector.broadcast %cst_32 : f32 to vector<2x32xf32>
      %c0_33 = arith.constant 0 : index
      %c0_34 = arith.constant 0 : index
      %46 = vector.load %arg9[%c0_33, %c0_34] : memref<2x32xf32, #tpu.memory_space<vmem>>, vector<2x32xf32>
      tpu.vector_store %arg9[%c0_33, %c0_34], %45 {strides = array<i32>} : memref<2x32xf32, #tpu.memory_space<vmem>>, vector<2x32xf32>,
    } else {
    }
    %c0 = arith.constant 0 : index
    %c0_1 = arith.constant 0 : index
    %3 = vector.load %arg4[%c0, %c0_1] : memref<1x32xf32, #tpu.memory_space<vmem>>, vector<1x32xf32>
    %4 = vector.shape_cast %3 : vector<1x32xf32> to vector<1x1x32xf32>
    %c0_2 = arith.constant 0 : index
    %c0_3 = arith.constant 0 : index
    %c0_4 = arith.constant 0 : index
    %5 = vector.load %arg3[%c0_2, %c0_3, %c0_4] : memref<2x8x32xf32, #tpu.memory_space<vmem>>, vector<2x8x32xf32>
    %6 = vector.broadcast %4 : vector<1x1x32xf32> to vector<2x8x32xf32>
    %7 = arith.mulf %5, %6 : vector<2x8x32xf32>
    %cst = arith.constant dense<0.000000e+00> : vector<2x8xf32>
    %8 = vector.multi_reduction <add>, %7, %cst [2] : vector<2x8x32xf32> to vector<2x8xf32>
    %c0_5 = arith.constant 0 : index
    %9 = memref.load %arg2[%c0_5] : memref<1xf32, #tpu.memory_space<smem>>
    %10 = vector.broadcast %9 : f32 to vector<2x8xf32>
    %11 = arith.addf %8, %10 : vector<2x8xf32>
    %c0_6 = arith.constant 0 : index
    %c0_7 = arith.constant 0 : index
    %12 = vector.load %arg7[%c0_6, %c0_7] : memref<2x1xf32, #tpu.memory_space<vmem>>, vector<2x1xf32>
    %cst_8 = arith.constant dense<0xFF800000> : vector<2xf32>
    %13 = vector.multi_reduction <maximumf>, %11, %cst_8 [1] : vector<2x8xf32> to vector<2xf32>
    %14 = vector.shape_cast %13 : vector<2xf32> to vector<2x1xf32>
    %15 = arith.maximumf %12, %14 : vector<2x1xf32>
    %16 = arith.subf %12, %15 : vector<2x1xf32>
    %17 = math.exp %16 : vector<2x1xf32>
    %18 = vector.broadcast %15 : vector<2x1xf32> to vector<2x8xf32>
    %19 = arith.subf %11, %18 : vector<2x8xf32>
    %20 = math.exp %19 : vector<2x8xf32>
    %c0_9 = arith.constant 0 : index
    %c0_10 = arith.constant 0 : index
    %21 = vector.load %arg8[%c0_9, %c0_10] : memref<2x1xf32, #tpu.memory_space<vmem>>, vector<2x1xf32>
    %22 = arith.mulf %17, %21 : vector<2x1xf32>
    %cst_11 = arith.constant dense<0.000000e+00> : vector<2xf32>
    %23 = vector.multi_reduction <add>, %20, %cst_11 [1] : vector<2x8xf32> to vector<2xf32>
    %24 = vector.shape_cast %23 : vector<2xf32> to vector<2x1xf32>
    %25 = arith.addf %22, %24 : vector<2x1xf32>
    %c0_12 = arith.constant 0 : index
    %c0_13 = arith.constant 0 : index
    %26 = vector.load %arg8[%c0_12, %c0_13] : memref<2x1xf32, #tpu.memory_space<vmem>>, vector<2x1xf32>
    tpu.vector_store %arg8[%c0_12, %c0_13], %25 {strides = array<i32>} : memref<2x1xf32, #tpu.memory_space<vmem>>, vector<2x1xf32>,
    %c0_14 = arith.constant 0 : index
    %c0_15 = arith.constant 0 : index
    %27 = vector.load %arg9[%c0_14, %c0_15] : memref<2x32xf32, #tpu.memory_space<vmem>>, vector<2x32xf32>
    %28 = vector.broadcast %17 : vector<2x1xf32> to vector<2x32xf32>
    %29 = arith.mulf %28, %27 : vector<2x32xf32>
    %30 = vector.shape_cast %20 : vector<2x8xf32> to vector<2x8x1xf32>
    %c0_16 = arith.constant 0 : index
    %c0_17 = arith.constant 0 : index
    %c0_18 = arith.constant 0 : index
    %31 = vector.load %arg3[%c0_16, %c0_17, %c0_18] : memref<2x8x32xf32, #tpu.memory_space<vmem>>, vector<2x8x32xf32>
    %32 = vector.broadcast %30 : vector<2x8x1xf32> to vector<2x8x32xf32>
    %33 = arith.mulf %32, %31 : vector<2x8x32xf32>
    %cst_19 = arith.constant dense<0.000000e+00> : vector<2x32xf32>
    %34 = vector.multi_reduction <add>, %33, %cst_19 [1] : vector<2x8x32xf32> to vector<2x32xf32>
    %35 = arith.addf %29, %34 : vector<2x32xf32>
    %c0_20 = arith.constant 0 : index
    %c0_21 = arith.constant 0 : index
    %36 = vector.load %arg9[%c0_20, %c0_21] : memref<2x32xf32, #tpu.memory_space<vmem>>, vector<2x32xf32>
    tpu.vector_store %arg9[%c0_20, %c0_21], %35 {strides = array<i32>} : memref<2x32xf32, #tpu.memory_space<vmem>>, vector<2x32xf32>,
    %c0_22 = arith.constant 0 : index
    %c0_23 = arith.constant 0 : index
    %37 = vector.load %arg7[%c0_22, %c0_23] : memref<2x1xf32, #tpu.memory_space<vmem>>, vector<2x1xf32>
    tpu.vector_store %arg7[%c0_22, %c0_23], %15 {strides = array<i32>} : memref<2x1xf32, #tpu.memory_space<vmem>>, vector<2x1xf32>,
    %c0_i32_24 = arith.constant 0 : i32
    %38 = arith.cmpi eq, %arg1, %c0_i32_24 : i32
    %39 = arith.extui %38 : i1 to i32
    %c0_i32_25 = arith.constant 0 : i32
    %40 = arith.cmpi ne, %39, %c0_i32_25 : i32
    scf.if %40 {
      %c0_26 = arith.constant 0 : index
      %c0_27 = arith.constant 0 : index
      %41 = vector.load %arg8[%c0_26, %c0_27] : memref<2x1xf32, #tpu.memory_space<vmem>>, vector<2x1xf32>
      %42 = tpu.reciprocal %41 {approx = true} : vector<2x1xf32> -> vector<2x1xf32>
      %c0_28 = arith.constant 0 : index
      %c0_29 = arith.constant 0 : index
      %43 = vector.load %arg9[%c0_28, %c0_29] : memref<2x32xf32, #tpu.memory_space<vmem>>, vector<2x32xf32>
      %44 = vector.broadcast %42 : vector<2x1xf32> to vector<2x32xf32>
      %45 = arith.mulf %43, %44 : vector<2x32xf32>
      %c0_30 = arith.constant 0 : index
      %c0_31 = arith.constant 0 : index
      %46 = vector.load %arg5[%c0_30, %c0_31] : memref<32x128xf32, #tpu.memory_space<vmem>>, vector<32x128xf32>
      %cst_32 = arith.constant dense<0.000000e+00> : vector<2x128xf32>
      %47 = tpu.matmul %45, %46, %cst_32 {dimension_numbers = #tpu.dot_dimension_numbers<[1], [0], [0], [1], [0, 0, 1, 1], [], []>} : vector<2x32xf32>, vector<32x128xf32>, vector<2x128xf32> -> vector<2x128xf32>
      %c0_33 = arith.constant 0 : index
      %c0_34 = arith.constant 0 : index
      %48 = vector.load %arg6[%c0_33, %c0_34] : memref<2x128xf32, #tpu.memory_space<vmem>>, vector<2x128xf32>
      tpu.vector_store %arg6[%c0_33, %c0_34], %47 {strides = array<i32>} : memref<2x128xf32, #tpu.memory_space<vmem>>, vector<2x128xf32>,
    } else {
    }
    return
  }
  func.func @transform_0(%arg0: i32, %arg1: i32) -> i32 {
    %c0_i32 = arith.constant 0 : i32
    %c0_i32_0 = arith.constant 0 : i32
    return %c0_i32 : i32
  }
  func.func @transform_1(%arg0: i32, %arg1: i32) -> (i32, i32, i32) {
    %c0_i32 = arith.constant 0 : i32
    %c0_i32_0 = arith.constant 0 : i32
    return %arg0, %arg1, %c0_i32 : i32, i32, i32
  }
  func.func @transform_2(%arg0: i32, %arg1: i32) -> (i32, i32) {
    %c0_i32 = arith.constant 0 : i32
    %c0_i32_0 = arith.constant 0 : i32
    %c0_i32_1 = arith.constant 0 : i32
    return %c0_i32, %c0_i32_0 : i32, i32
  }
  func.func @transform_3(%arg0: i32, %arg1: i32) -> (i32, i32) {
    %c0_i32 = arith.constant 0 : i32
    %c0_i32_0 = arith.constant 0 : i32
    %c0_i32_1 = arith.constant 0 : i32
    return %c0_i32, %c0_i32_0 : i32, i32
  }
  func.func @transform_4(%arg0: i32, %arg1: i32) -> (i32, i32) {
    %c0_i32 = arith.constant 0 : i32
    %c0_i32_0 = arith.constant 0 : i32
    return %arg0, %c0_i32 : i32, i32
  }
}

</mosaic_0001>

<bundles_post_ra>
// kernel: tpu_custom_call.1
= control target key start
LH: loop header
LB: loop body
LE: loop exit
PB: predicated region body
PF: predicated region fallthrough
CT: control target
= control target key end

     0   :  { %10 = vsyncpa [#allocation7], 0  ;;  %s509_s0 = inlined_call_operand.<no memory space> [shape: f32[1], index: 0, kind: input, shape index: {}]   ;;  %s510_s1 = inlined_call_operand.hbm [shape: f32[2,8,32], index: 1, kind: input, shape index: {}]   ;;  %s511_s2 = inlined_call_operand.vmem [shape: f32[1,32], index: 2, kind: input, shape index: {}]   ;;  %s512_s3 = inlined_call_operand.hbm [shape: f32[32,128], index: 3, kind: input, shape index: {}]   ;;  %s513_s4 = inlined_call_operand.hbm [shape: f32[2,128], index: 4, kind: output, shape index: {}]  }
   0x1   :  { %11 = vsyncpa [#allocation10], 0 }
   0x2   :  { %12 = vsyncpa [#allocation8], 0  ;;  %s405_s15 = smov [#allocation6]   ;;  %s333_s19 = scalar_lea.hbm %s510_s1, 256 }
   0x3   :  { %s20_s16 = sshll.u32 %s405_s15, 4  ;;  %p334_p0 = scmp.ne.s32.totalorder %s510_s1, %s333_s19  ;;  %s21_s16 = int_to_ptr.vmem [resolvable:$true] %s20_s16 }
   0x4   :  { %p337_p1 = scmp.lt.u32.totalorder %s333_s19, %s510_s1 }
   0x6   :  { %p339_p2 = pnand %p337_p1, %p334_p0 }
   0x8   :  { %342 = shalt.err (!%p339_p2)
}
   0x9   :  { %s343_s24 = scalar_lea.vmem %s21_s16, 256  ;;  %p348_p4 = scmp.lt.s32.totalorder %s21_s16, %s21_s16 }
   0xa   :  { %p344_p3 = scmp.ne.s32.totalorder %s21_s16, %s343_s24  ;;  %p349_p5 = scmp.lt.s32.totalorder %s343_s24, %s343_s24 }
   0xc   :  { %p350_p6 = por %p349_p5, %p348_p4 }
   0xe   :  { %p351_p7 = pnand %p350_p6, %p344_p3 }
  0x10   :  { %354 = shalt.err (!%p351_p7)
}
  0x11   :  { %s406_s25 = smov 128   ;;  %s407_s26 = smov 8  }
  0x12   :  { %26 = dma.hbm_to_vmem [thread:$0]  %s510_s1, 256, %s21_s16, [#allocation7], %s406_s25, %s406_s25, %s407_s26  }
  0x13   :  { %s408_s29 = smov [#allocation9]   ;;  %s355_s7 = scalar_lea.hbm %s512_s3, 512 }
  0x14   :  { %s34_s30 = sshll.u32 %s408_s29, 4  ;;  %p356_p8 = scmp.ne.s32.totalorder %s512_s3, %s355_s7  ;;  %s35_s30 = int_to_ptr.vmem [resolvable:$true] %s34_s30 }
  0x15   :  { %p359_p9 = scmp.lt.u32.totalorder %s355_s7, %s512_s3 }
  0x17   :  { %p361_p10 = pnand %p359_p9, %p356_p8 }
  0x19   :  { %364 = shalt.err (!%p361_p10)
}
  0x1a   :  { %s365_s12 = scalar_lea.vmem %s35_s30, 512  ;;  %p370_p12 = scmp.lt.s32.totalorder %s35_s30, %s35_s30 }
  0x1b   :  { %p366_p11 = scmp.ne.s32.totalorder %s35_s30, %s365_s12  ;;  %p371_p13 = scmp.lt.s32.totalorder %s365_s12, %s365_s12 }
  0x1d   :  { %p372_p0 = por %p371_p13, %p370_p12 }
  0x1f   :  { %p373_p1 = pnand %p372_p0, %p366_p11 }
  0x21   :  { %376 = shalt.err (!%p373_p1)
}
  0x22   :  { %40 = dma.hbm_to_vmem [thread:$0]  %s512_s3, 512, %s35_s30, [#allocation10], %s406_s25, %s406_s25, %s407_s26  }
  0x23   :  { %399 = dma.done.wait [#allocation7], 256  }
  0x24   :  { %400 = vsyncadd [#allocation7], 4294967040 }
  0x25   :  { %401 = dma.done.wait [#allocation10], 512  }
  0x26   :  { %402 = vsyncadd [#allocation10], 4294966784  ;;  %v289_v0 = vld [vmem:[%s511_s2] ss:$0 sm:$0xff]  ;;  %v467_v1 = vld [vmem:[#allocation6] sm:$0xff]  ;;  %vm67_vm0 = vcmask 261120   ;;  %v81_v8 = vlaneseq  ;;  %v75_v11 = vstv %s509_s0 }
  0x27   :  { %v469_v2 = vld [vmem:[#allocation6 + $0x8] sm:$0xff]  ;;  %v65_v3 = vmul.f32 %v289_v0, %v467_v1  ;;  %vm51_vm1 = vcmask 1024   ;;  %v409_v7 = vmov -inf   ;;  %vm91_vm2 = vcmask 1041409   ;;  %s414_s0 = smov [#allocation11]  }
  0x28   :  { %v66_v4 = vmul.f32 %v289_v0, %v469_v2  ;;  %52 = vst.msk [vmem:[#allocation2] sm:$0x3] %vm51_vm1, %v409_v7  ;;  %v82_v9 = vand.u32 127, %v81_v8  ;;  %v84_v10 = vshrl.u32 %v81_v8, 7  ;;  %vm94_vm3 = vcmask 58368   ;;  %v198_v8 = vld [vmem:[#allocation9 + $0x18] sm:$0xff] }
  0x29   :  { %v68_v5 = vsel %vm67_vm0, %v65_v3, 0.0  ;;  %v410_v21 = vmov 0   ;;  %v411_v22 = vmov 0.0   ;;  %vm54_vm4 = vcmask 254976   ;;  %v195_v3 = vld [vmem:[#allocation9] sm:$0xff]  ;;  %s279_s16 = sshll.u32 %s414_s0, 4  ;;  %s280_s16 = int_to_ptr.vmem [resolvable:$true] %s279_s16 }
  0x2a   :  { %69 = vadd.xlane.f32.xlu0 %v68_v5  ;;  %v71_v6 = vsel %vm67_vm0, %v66_v4, 0.0  ;;  %v85_v13 = vsub.s32 %v82_v9, %v84_v10  ;;  %323 = vset.pattern.permute.xlu1 %v410_v21  ;;  %53 = vst.msk [vmem:[#allocation3] sm:$0x3] %vm51_vm1, %v411_v22  ;;  %v108_v27 = vsub.s32 0, %v84_v10  ;;  %v112_v28 = vsub.s32 1, %v84_v10  ;;  %v196_v4 = vld [vmem:[#allocation9 + $0x8] sm:$0xff]  ;;  %p382_p3 = scmp.lt.s32.totalorder %s280_s16, %s280_s16 }
  0x2b   :  { %324 = vset.pattern.permute.xlu0 %v410_v21  ;;  %55 = vst.msk [vmem:[#allocation4] sm:$0x3] %vm54_vm4, %v411_v22  ;;  %v197_v5 = vld [vmem:[#allocation9 + $0x10] sm:$0xff]  ;;  %v308_v7 = vpack.c.bf16 %v196_v4, %v195_v3  ;;  %vm413_vm5 = vmmov 0   ;;  %s377_s17 = scalar_lea.vmem %s280_s16, 32 }
  0x2c   :  { %v311_v9 = vpack.c.bf16 %v198_v8, %v197_v5  ;;  %304 = vmatprep.mubr.msk.f32.mxu0 %vm413_vm5, %v411_v22  ;;  %p378_p2 = scmp.ne.s32.totalorder %s280_s16, %s377_s17  ;;  %p383_p4 = scmp.lt.s32.totalorder %s377_s17, %s377_s17 }
  0x2e   :  { %72 = vadd.xlane.f32.xlu0 %v71_v6  ;;  %v412_v6 = vmov 0.0|0.0   ;;  %p384_p5 = por %p383_p4, %p382_p3 }
  0x2f   :  { %v78_v23 = vld [vmem:[#allocation2] sm:$0x3]  ;;  %307 = vmatprep.subr.bf16.mxu0 %v412_v6 }
  0x30   :  { %309 = vmatpush3.bf16.msra.mxu0 %v308_v7  ;;  %p385_p6 = pnand %p384_p5, %p378_p2 }
  0x31   :  { %310 = vmatprep.subr.bf16.mxu0 %v412_v6  ;;  %v122_v10 = vld [vmem:[#allocation3] sm:$0x3] }
  0x32   :  { %v148_v60 = vld [vmem:[#allocation4] sm:$0x3] }
  0x34   :  { %312 = vmatpush3.bf16.msra.mxu0 %v311_v9 }
  0xb7   :  { %v70_v12 = vpop.xlane.xlu0 %69 }
  0xb8   :  { %v76_v14 = vadd.f32 %v75_v11, %v70_v12 }
  0xba   :  { %v86_v17 = vrot.slane %v76_v14, %v85_v13 }
  0xbb   :  { %v73_v15 = vpop.xlane.xlu0 %72 }
  0xbc   :  { %v77_v16 = vadd.f32 %v75_v11, %v73_v15 }
  0xbe   :  { %v90_v18 = vrot.slane %v77_v16, %v85_v13 }
  0xc0   :  { %v92_v19 = vsel %vm91_vm2, %v90_v18, %v86_v17 }
  0xc1   :  { %v95_v20 = vsel %vm94_vm3, %v92_v19, -inf }
  0xc2   :  { %96 = vmax.xlane.f32.xlu1 %v95_v20 }
 0x14f   :  { %v97_v24 = vpop.xlane.xlu1 %96 }
 0x150   :  { %v98_v25 = vmax.f32 %v78_v23, %v97_v24 }
 0x152   :  { %v99_v26 = vsub.f32 %v78_v23, %v98_v25  ;;  %182 = vst.msk [vmem:[#allocation2] sm:$0x3] %vm51_vm1, %v98_v25  ;;  %104 = vperm.xlu1 %323, %v98_v25  }
 0x154   :  { %v100_v36 = vmul.f32 1.442695, %v99_v26 }
 0x1d1   :  { %v105_v29 = vpop.permute.xlu1 %104 }
 0x1d2   :  { %v109_v30 = vrot.slane %v105_v29, %v108_v27  ;;  %v113_v31 = vrot.slane %v105_v29, %v112_v28 }
 0x1d4   :  { %v116_v32 = vsub.f32 %v76_v14, %v109_v30  ;;  %v117_v33 = vsub.f32 %v77_v16, %v113_v31 }
 0x1d6   :  { %v118_v34 = vmul.f32 1.442695, %v116_v32  ;;  %v120_v35 = vmul.f32 1.442695, %v117_v33 }
 0x1d8   :  { %325 = vpow2.f32 %v118_v34 }
 0x1d9   :  { %327 = vpow2.f32 %v120_v35 }
 0x1da   :  { %329 = vpow2.f32 %v100_v36 }
 0x1e2   :  { %v326_v37 = vpop.eup %325 }
 0x1e3   :  { %v328_v38 = vpop.eup %327  ;;  %127 = vperm.xlu0 %324, %v326_v37  }
 0x1e4   :  { %130 = vperm.xlu1 %323, %v328_v38   ;;  %v330_v39 = vpop.eup %329 }
 0x1e5   :  { %v123_v11 = vmul.f32 %v330_v39, %v122_v10 }
 0x1e7   :  { %151 = vperm.xlu0 %324, %v330_v39  }
 0x262   :  { %v128_v40 = vpop.permute.xlu0 %127 }
 0x263   :  { %v131_v41 = vpop.permute.xlu1 %130  ;;  %v135_v42 = vrot.slane %v128_v40, %v85_v13  ;;  %v159_v43 = vmul.f32 %v128_v40, %v467_v1 }
 0x264   :  { %v139_v44 = vrot.slane %v131_v41, %v85_v13  ;;  %v160_v45 = vmul.f32 %v131_v41, %v469_v2 }
 0x265   :  { %v161_v46 = vsel %vm67_vm0, %v159_v43, 0.0 }
 0x266   :  { %v168_v47 = vsel %vm67_vm0, %v160_v45, 0.0  ;;  %v162_v48 = vrot.slane %v161_v46, 4  ;;  %v140_v49 = vsel %vm91_vm2, %v139_v44, %v135_v42  ;;  %v152_v61 = vpop.permute.xlu0 %151 }
 0x267   :  { %v169_v50 = vrot.slane %v168_v47, 4  ;;  %v142_v51 = vsel %vm94_vm3, %v140_v49, 0.0  ;;  %v154_v0 = vmul.f32 %v152_v61, %v148_v60 }
 0x268   :  { %v163_v52 = vadd.f32 %v162_v48, %v161_v46  ;;  %143 = vadd.xlane.f32.xlu1 %v142_v51 }
 0x269   :  { %v170_v53 = vadd.f32 %v169_v50, %v168_v47 }
 0x26a   :  { %v164_v54 = vrot.slane %v163_v52, 2 }
 0x26b   :  { %v171_v55 = vrot.slane %v170_v53, 2 }
 0x26c   :  { %v165_v56 = vadd.f32 %v164_v54, %v163_v52 }
 0x26d   :  { %v172_v57 = vadd.f32 %v171_v55, %v170_v53 }
 0x26e   :  { %v166_v58 = vrot.slane %v165_v56, 1 }
 0x26f   :  { %v173_v59 = vrot.slane %v172_v57, 1 }
 0x270   :  { %v167_v62 = vadd.f32 %v166_v58, %v165_v56 }
 0x271   :  { %v174_v63 = vadd.f32 %v173_v59, %v172_v57 }
 0x273   :  { %v177_v1 = vsel %vm91_vm2, %v174_v63, %v167_v62 }
 0x274   :  { %v179_v2 = vadd.f32 %v177_v1, %v154_v0 }
 0x276   :  { %181 = vst.msk [vmem:[#allocation4] sm:$0x3] %vm54_vm4, %v179_v2 }
 0x27d   :  { %v188_v16 = vld [vmem:[#allocation4] sm:$0x3] }
 0x2f5   :  { %v144_v12 = vpop.xlane.xlu1 %143 }
 0x2f6   :  { %v145_v13 = vadd.f32 %v144_v12, %v123_v11 }
 0x2f8   :  { %147 = vst.msk [vmem:[#allocation3] sm:$0x3] %vm51_vm1, %v145_v13 }
 0x2ff   :  { %v186_v14 = vld [vmem:[#allocation3] sm:$0x3] }
 0x300   :  { %331 = vrcp.f32 %v186_v14 }
 0x30a   :  { %v332_v15 = vpop.eup %331 }
 0x30b   :  { %191 = vperm.xlu0 %324, %v332_v15  }
 0x38a   :  { %v192_v17 = vpop.permute.xlu0 %191 }
 0x38b   :  { %v194_v18 = vmul.f32 %v192_v17, %v188_v16 }
 0x38d   :  { %305 = vmatmul.mubr.msk.f32.vlgmr.msra.gmra.mrb[0].mxu0 %vm67_vm0, %v194_v18 }
 0x460   :  { %v268_v19 = vpop.f32.mrb[0].mxu0 }
 0x461   :  { %272 = vst [vmem:[#allocation11] sm:$0x3] %v268_v19  ;;  %v306_v20 = vpop.f32.mrb[1].mxu0 }
 0x462   :  { %388 = shalt.err (!%p385_p6)
}
 0x463   :  { %s389_s20 = scalar_lea.hbm %s513_s4, 32 }
 0x464   :  { %p390_p7 = scmp.ne.s32.totalorder %s513_s4, %s389_s20  ;;  %p393_p8 = scmp.lt.u32.totalorder %s389_s20, %s513_s4 }
 0x466   :  { %p395_p9 = pnand %p393_p8, %p390_p7 }
 0x468   :  { %398 = shalt.err (!%p395_p9)
}
 0x469   :  { %282 = dma.vmem_to_hbm [thread:$0]  %s280_s16, 32, %s513_s4, [#allocation8]  }
 0x46a   :  { %403 = dma.done.wait [#allocation8], 32  }
 0x46b   :  { %404 = vsyncadd [#allocation8], 4294967264 }
 0x46c   :  { %286 = vsyncpa [#allocation7], 1 }
 0x46d   :  { %287 = vsyncpa [#allocation10], 1 }
 0x46e   :  { %288 = vsyncpa [#allocation8], 1 }

</bundles_post_ra>
